<compile_context>
chip_gen: v5e
topology: v5e:2x2
jax: 0.10.0
libtpu: 0.0.40
codegen_flags: <defaults>
</compile_context>

<pallas_src>
import jax
import jax.numpy as jnp
from jax.experimental import pallas as pl
from jax.experimental.pallas import tpu as pltpu


_LANE = 128                          # full vreg lane width -> unmasked stores
_TILE_BYTES_TARGET = 4 * 1024 * 1024  # ~4 MiB per block; x2 double-buffer x2
                                       # (in+out) = 16 MiB, fits 32 MiB scoped
                                       # VMEM on v5e/v6e/v7x.
_KERNEL_MIN_BYTES = 256 * 1024        # below this, kernel overhead dominates:
                                       # identity forward just returns x.


def _copy_kernel(x_ref, o_ref):
    # TODO(synk): ContinualLerner.forward is @abc.abstractmethod (no body);
    # the only faithful base-class semantics is a pass-through copy.
    o_ref[...] = x_ref[...]


def _sublane_multiple(dtype) -> int:
    """Row-tile granularity: 8 for 32-bit, 16 for bf16, 32 for int8/fp8."""
    itemsize = jnp.dtype(dtype).itemsize
    return max(8, 8 * (4 // max(itemsize, 1)))


@jax.jit
def _identity_pallas(x):
    """Identity pass-through via a tiled, lane-dense Pallas copy."""
    orig_shape = x.shape
    total = x.size
    if total == 0:
        # Empty-array guard: a zero-width BlockSpec would not lower.
        return x

    itemsize = jnp.dtype(x.dtype).itemsize
    sub = _sublane_multiple(x.dtype)

    # Lane-dense 2-D slab: pad (wrapper-side, cheap) so the trailing dim is a
    # full 128 lanes -> unmasked vector stores in the kernel.
    flat = x.reshape(-1)
    pad = (-total) % _LANE
    if pad:
        flat = jnp.pad(flat, (0, pad))
    padded_total = total + pad
    cols = _LANE
    rows = padded_total // cols
    x2d = flat.reshape(rows, cols)

    # Row tiling: target ~4 MiB per block (amortizes the ~0.35 us per-step
    # overhead on every generation, incl. v7x's 3.2 TB/s HBM), rows a multiple
    # of the dtype-aware sublane pack, and >=2 grid steps when rows allow it
    # so the "parallel" axis can shard across v7x's two TensorCores.
    tile_rows_max = max(sub, (_TILE_BYTES_TARGET // (cols * itemsize)) // sub * sub)
    if rows <= sub:
        tile_rows = rows                      # equals full dim -> (8,128) rule OK
    elif rows >= 2 * sub:
        half = ((pl.cdiv(rows, 2) + sub - 1) // sub) * sub
        tile_rows = min(tile_rows_max, half)
    else:
        tile_rows = sub
    grid = (pl.cdiv(rows, tile_rows),)

    out2d = pl.pallas_call(
        _copy_kernel,
        out_shape=jax.ShapeDtypeStruct(x2d.shape, x2d.dtype),
        grid=grid,
        in_specs=[pl.BlockSpec((tile_rows, cols), lambda i: (i, 0))],
        out_specs=pl.BlockSpec((tile_rows, cols), lambda i: (i, 0)),
        cost_estimate=pl.CostEstimate(
            flops=0,
            transcendentals=0,
            bytes_accessed=2 * padded_total * itemsize,
        ),
        compiler_params=pltpu.CompilerParams(
            # Row-tile axis is independent: lets v7x shard it across both
            # TensorCores; no-op on single-core v5e/v6e.
            dimension_semantics=("parallel",),
            vmem_limit_bytes=32 * 1024 * 1024,
        ),
    )(x2d)

    out_flat = out2d.reshape(-1)
    if pad:
        out_flat = out_flat[:total]
    return out_flat.reshape(orig_shape)


class ContinualLernerPallas:
    """JAX/Pallas mirror of the abstract ContinualLerner base class.

    Holds the same (non-parametric) bookkeeping state as the PyTorch module.
    `forward` is an identity pass-through: for small inputs it simply returns
    x (no kernel launch, no HBM round-trip); for large inputs it runs the
    tuned tiled Pallas copy.
    """

    def __init__(self):
        self.scenario = None
        self.tasks = 0
        self.task_nr = 0
        self.classes_per_task = 0
        self.multihead = None

    def forward(self, x):
        if x.size * jnp.dtype(x.dtype).itemsize < _KERNEL_MIN_BYTES:
            # Highest-value optimization: do not launch a kernel for an
            # identity on small inputs — launch overhead is 100% of the cost.
            return x
        return _identity_pallas(x)

    def __call__(self, x):
        return self.forward(x)


if __name__ == "__main__":
    key = jax.random.PRNGKey(0)
    model = ContinualLernerPallas()

    # Small NCHW input consistent with a vision continual-learning setup.
    x_small = jax.random.normal(key, (2, 4, 16, 16), dtype=jnp.float32)

    # Forward path on the small input -> fast pass-through (no kernel).
    y_small = jax.block_until_ready(model(x_small))
    assert y_small.shape == x_small.shape and y_small.dtype == x_small.dtype
    assert bool(jnp.allclose(y_small, x_small)), "identity fast path mismatch"

    # Run the Pallas copy kernel explicitly once on the small input
    # (128-divisible path: 16x128 slab, grid=(2,)).
    y_kernel = jax.block_until_ready(_identity_pallas(x_small))
    assert y_kernel.shape == x_small.shape and y_kernel.dtype == x_small.dtype
    assert bool(jnp.allclose(y_kernel, x_small)), "identity kernel mismatch"

    # Exercise the padded (non-128-divisible) path as well.
    x_odd = jax.random.normal(jax.random.PRNGKey(1), (3, 5, 7), dtype=jnp.float32)
    y_odd = jax.block_until_ready(_identity_pallas(x_odd))
    assert y_odd.shape == x_odd.shape
    assert bool(jnp.allclose(y_odd, x_odd)), "padded-path identity mismatch"

    # Large-enough input so model.forward itself takes the kernel path.
    x_big = jax.random.normal(jax.random.PRNGKey(2), (2, 4, 128, 128),
                              dtype=jnp.float32)  # 512 KiB >= threshold
    y_big = jax.block_until_ready(model(x_big))
    assert y_big.shape == x_big.shape
    assert bool(jnp.allclose(y_big, x_big)), "kernel-path identity mismatch"

    print("KERNEL_OK")
</pallas_src>

<mosaic_0001>
module attributes {stable_mosaic.version = 11 : i64} {
  func.func @_copy_kernel(%arg0: i32, %arg1: memref<8x128xf32, #tpu.memory_space<vmem>>, %arg2: memref<8x128xf32, #tpu.memory_space<vmem>>) attributes {dimension_semantics = [#tpu.dimension_semantics<parallel>], iteration_bounds = array<i64: 2>, scalar_prefetch = 0 : i64, scratch_operands = 0 : i64, tpu.core_type = #tpu.core_type<tc>, window_params = [{transform_indices = @transform_0, window_bounds = array<i64: 8, 128>}, {transform_indices = @transform_1, window_bounds = array<i64: 8, 128>}]} {
    %c0 = arith.constant 0 : index
    %c0_0 = arith.constant 0 : index
    %0 = vector.load %arg1[%c0, %c0_0] : memref<8x128xf32, #tpu.memory_space<vmem>>, vector<8x128xf32>
    %c0_1 = arith.constant 0 : index
    %c0_2 = arith.constant 0 : index
    %1 = vector.load %arg2[%c0_1, %c0_2] : memref<8x128xf32, #tpu.memory_space<vmem>>, vector<8x128xf32>
    tpu.vector_store %arg2[%c0_1, %c0_2], %0 {strides = array<i32>} : memref<8x128xf32, #tpu.memory_space<vmem>>, vector<8x128xf32>,
    return
  }
  func.func @transform_0(%arg0: i32) -> (i32, i32) {
    %c0_i32 = arith.constant 0 : i32
    %c0_i32_0 = arith.constant 0 : i32
    return %arg0, %c0_i32 : i32, i32
  }
  func.func @transform_1(%arg0: i32) -> (i32, i32) {
    %c0_i32 = arith.constant 0 : i32
    %c0_i32_0 = arith.constant 0 : i32
    return %arg0, %c0_i32 : i32, i32
  }
}

</mosaic_0001>

<bundles_post_ra>
// kernel: _identity_pallas.1
= control target key start
LH: loop header
LB: loop body
LE: loop exit
PB: predicated region body
PF: predicated region fallthrough
CT: control target
= control target key end

     0   :  { %s188_s6 = smov 0   ;;  %s208_s0 = inlined_call_operand.vmem [shape: f32[16,128], index: 0, kind: input, shape index: {}]   ;;  %s209_s1 = inlined_call_operand.vmem [shape: f32[16,128], index: 1, kind: output, shape index: {}]  }
   0x1 LB: > { %s167_s7 = sadd.s32 4294967295, %s190_s6   ;;  %p171_p0 = scmp.ge.s32.totalorder %s190_s6, 1  ;;  %s190_s6 = sphi %s188_s6, %s11_s6  }
   0x2   : > { %p86_p1 = scmp.lt.s32.totalorder %s190_s6, 3 }
   0x4   : > { %p87_p2 = pnand %p171_p0, %p86_p1 }
   0x5   : > { %p104_p3 = scmp.lt.s32.totalorder (!%p87_p2), %s167_s7, 1 }
   0x6   : > { %90 = sbr.rel (%p87_p2) target bundleno = 16 (0x10), region = 24 }
   0xb   : > { %s211_s7 = smov (!%p104_p3, %s167_s7), 1 }
   0xc   : > { %s172_s8 = sshll.u32 %s211_s7, 3 }
   0xd   : > { %s107_s11 = scalar_lea.vmem %s208_s0, %s172_s8  ;;  %s111_s14 = scalar_lea.vmem %s209_s1, %s172_s8 }
   0xe   : > { %v112_v0 = vld [vmem:[%s107_s11] sm:$0xff] }
   0xf   : > { %113 = vst [vmem:[%s111_s14] sm:$0xff] %v112_v0 }
  0x10 PF: > { %s11_s6 = sadd.s32 1, %s190_s6  }
  0x11   : > { %p8_p4 = scmp.ge.s32.totalorder %s11_s6, 4  }
  0x13   :  { %10 = sbr.rel (!%p8_p4) target bundleno = 1 (0x1), region = 54 }

</bundles_post_ra>
